<compile_context>
chip_gen: v7x
topology: tpu7x:2x2x1
jax: 0.10.0
libtpu: 0.0.40
codegen_flags: <defaults>
</compile_context>

<pallas_src>
import functools

import jax
import jax.numpy as jnp
from jax.experimental import pallas as pl
from jax.experimental.pallas import tpu as pltpu


def _round_up(x, m):
    return ((x + m - 1) // m) * m


# ---------------------------------------------------------------------------
# Kernels
# ---------------------------------------------------------------------------

def _csi_osi_kernel(label_ref, scores_ref, loss_ref, *,
                    task, targeted, confidence, threshold, clip_max):
    scores = scores_ref[...]                       # (TB, C), native dtype
    label = label_ref[...]                         # (TB, 1) int32
    TB, C = scores.shape
    conf = jnp.float32(confidence)
    neg_inf = jnp.array(-jnp.inf, dtype=scores.dtype)   # bf16-representable
    zero = jnp.zeros((), dtype=scores.dtype)

    col = jax.lax.broadcasted_iota(jnp.int32, (TB, C), dimension=1)
    mask = (col == label)                          # (TB, C) true-class mask
    # Masked select + row reductions in native dtype (VPU select -> XLU reduce);
    # exact because only one element per row survives the sum.
    score_real = jnp.sum(jnp.where(mask, scores, zero),
                         axis=1, keepdims=True).astype(jnp.float32)   # (TB,1)
    score_other = jnp.max(jnp.where(mask, neg_inf, scores),
                          axis=1, keepdims=True).astype(jnp.float32)  # (TB,1)

    if task == 'CSI':
        if targeted:
            consider_loss = score_other + conf - score_real
        else:
            consider_loss = score_real + conf - score_other
        imposter_loss = jnp.zeros_like(consider_loss)   # 0.0 * sum(scores)
    else:  # 'OSI'
        thr = jnp.float32(threshold)
        # For label == -1 rows the mask is empty, so score_other == max(scores):
        # no separate full-width row-max is needed.
        if targeted:
            consider_loss = jnp.maximum(score_other, thr) + conf - score_real
            imposter_loss = score_other + conf - thr
        else:
            score_max = jnp.maximum(score_other, score_real)   # max over all
            f_reject = score_max + conf - thr
            f_mis = jnp.maximum(score_real, thr) + conf - score_other
            consider_loss = jnp.minimum(f_reject, f_mis)
            imposter_loss = thr + conf - score_other

    loss = jnp.where(label == -1, imposter_loss, consider_loss)
    if clip_max:
        loss = jnp.maximum(jnp.float32(0.0), loss)
    loss_ref[...] = loss.astype(jnp.float32)


def _sv_kernel(label_ref, scores_ref, loss_ref, *,
               targeted, confidence, threshold, clip_max):
    # Lane-major: scores/label are (1, TL); purely elementwise.
    s = scores_ref[...].astype(jnp.float32)        # (1, TL)
    label = label_ref[...]                         # (1, TL) int32
    conf = jnp.float32(confidence)
    thr = jnp.float32(threshold)
    if targeted:
        enroll_loss = thr + conf - s
        imposter_loss = s + conf - thr
    else:
        enroll_loss = s + conf - thr
        imposter_loss = thr + conf - s
    loss = jnp.where(label == 0, enroll_loss, imposter_loss)
    if clip_max:
        loss = jnp.maximum(jnp.float32(0.0), loss)
    loss_ref[...] = loss


# ---------------------------------------------------------------------------
# Tile choosers
# ---------------------------------------------------------------------------

def _choose_batch_tile(B, C, itemsize):
    """Batch tile for (B, C) scores: multiple of 16 sublanes, ~6 MiB of *padded*
    scores per tile, capped so the grid keeps >= 4 steps (v7x megacore)."""
    if B <= 16:
        return B                                   # block equals full batch dim
    padded_c = _round_up(C, 128)
    target_bytes = 6 * 1024 * 1024                 # 4-8 MiB sweet spot
    tb = max(16, target_bytes // (padded_c * itemsize))
    tb = min(tb, max(16, B // 4))                  # >= 4 grid steps when possible
    tb = max(16, (tb // 16) * 16)                  # bf16/int8 sublane packing
    return min(tb, B)


def _choose_lane_tile(B, itemsize):
    """Lane tile for the SV (1, B) layout: multiple of 128, ~2 MiB per tile."""
    if B <= 128:
        return B                                   # block equals full lane dim
    tl = (2 * 1024 * 1024) // max(1, itemsize)
    tl = min(tl, max(128, B // 4))
    tl = max(128, (tl // 128) * 128)
    return min(tl, B)


# ---------------------------------------------------------------------------
# Wrapper
# ---------------------------------------------------------------------------

def sec4sr_margin_loss(scores, label, *, targeted=False, confidence=0.0,
                       task='CSI', threshold=None, clip_max=True):
    """Pallas implementation of SEC4SR_MarginLoss.forward (returns (B,) f32)."""
    B, C = scores.shape
    if task in ('SV', 'OSI'):
        assert threshold is not None, f"task={task!r} requires a float threshold"
    itemsize = scores.dtype.itemsize

    if task == 'SV':
        # Batch on lanes: (B, 1) scores -> (1, B); elementwise, lane-dense stores.
        scores_l = scores.reshape(1, B)
        label_l = label.astype(jnp.int32).reshape(1, B)
        tl = _choose_lane_tile(B, itemsize)
        grid = (pl.cdiv(B, tl),)
        kernel = functools.partial(
            _sv_kernel, targeted=targeted, confidence=float(confidence),
            threshold=float(threshold), clip_max=clip_max)
        cost = pl.CostEstimate(
            flops=4 * B, transcendentals=0,
            bytes_accessed=B * itemsize + B * 4 + B * 4)
        loss = pl.pallas_call(
            kernel,
            out_shape=jax.ShapeDtypeStruct((1, B), jnp.float32),
            grid=grid,
            in_specs=[
                pl.BlockSpec((1, tl), lambda i: (0, i)),   # label
                pl.BlockSpec((1, tl), lambda i: (0, i)),   # scores
            ],
            out_specs=pl.BlockSpec((1, tl), lambda i: (0, i)),
            compiler_params=pltpu.CompilerParams(
                dimension_semantics=("parallel",)),
            cost_estimate=cost,
        )(label_l, scores_l)
        return loss.reshape(B)

    # CSI / OSI: (B, C) layout, batch-tiled grid.
    label2d = label.astype(jnp.int32).reshape(B, 1)
    tb = _choose_batch_tile(B, C, itemsize)
    grid = (pl.cdiv(B, tb),)

    # vmem limit from the padded, double-buffered footprint (+ temporaries).
    padded_c = _round_up(C, 128)
    tile_scores_bytes = tb * padded_c * itemsize
    tile_aux_bytes = tb * 128 * 4 * 2              # label + output blocks (padded lanes)
    footprint = 2 * (tile_scores_bytes + tile_aux_bytes)   # double buffering
    vmem_limit = int(min(48 * 2**20, max(16 * 2**20, 2 * footprint + (2 << 20))))

    kernel = functools.partial(
        _csi_osi_kernel,
        task=task, targeted=targeted, confidence=float(confidence),
        threshold=(None if threshold is None else float(threshold)),
        clip_max=clip_max)
    cost = pl.CostEstimate(
        flops=6 * B * C, transcendentals=0,
        bytes_accessed=B * C * itemsize + B * 4 + B * 4)
    loss = pl.pallas_call(
        kernel,
        out_shape=jax.ShapeDtypeStruct((B, 1), jnp.float32),
        grid=grid,
        in_specs=[
            pl.BlockSpec((tb, 1), lambda i: (i, 0)),   # label
            pl.BlockSpec((tb, C), lambda i: (i, 0)),   # scores (native dtype)
        ],
        out_specs=pl.BlockSpec((tb, 1), lambda i: (i, 0)),
        compiler_params=pltpu.CompilerParams(
            dimension_semantics=("parallel",),         # rows independent
            vmem_limit_bytes=vmem_limit),
        cost_estimate=cost,
    )(label2d, scores)
    return loss.reshape(B)


# ---------------------------------------------------------------------------
# Pure-JAX references (for in-script sanity checks)
# ---------------------------------------------------------------------------

def _reference_csi(scores, label, targeted=False, confidence=0.0, clip_max=True):
    B, C = scores.shape
    scores = scores.astype(jnp.float32)
    onehot = jax.nn.one_hot(jnp.clip(label, 0, C - 1), C, dtype=jnp.float32)
    score_real = jnp.sum(onehot * scores, axis=1)
    score_other = jnp.max(jnp.where(onehot > 0, -jnp.inf, scores), axis=1)
    if targeted:
        loss = score_other + confidence - score_real
    else:
        loss = score_real + confidence - score_other
    loss = jnp.where(label == -1, 0.0, loss)
    if clip_max:
        loss = jnp.maximum(0.0, loss)
    return loss


def _reference_osi(scores, label, threshold, targeted=False, confidence=0.0,
                   clip_max=True):
    B, C = scores.shape
    scores = scores.astype(jnp.float32)
    onehot = jax.nn.one_hot(jnp.clip(label, 0, C - 1), C, dtype=jnp.float32)
    score_real = jnp.sum(onehot * scores, axis=1)
    score_other = jnp.max(jnp.where(onehot > 0, -jnp.inf, scores), axis=1)
    score_max = jnp.max(scores, axis=1)
    if targeted:
        consider = jnp.maximum(score_other, threshold) + confidence - score_real
        imposter = score_max + confidence - threshold
    else:
        f_reject = score_max + confidence - threshold
        f_mis = jnp.maximum(score_real, threshold) + confidence - score_other
        consider = jnp.minimum(f_reject, f_mis)
        imposter = threshold + confidence - score_max
    loss = jnp.where(label == -1, imposter, consider)
    if clip_max:
        loss = jnp.maximum(0.0, loss)
    return loss


def _reference_sv(scores, label, threshold, targeted=False, confidence=0.0,
                  clip_max=True):
    s = scores.astype(jnp.float32)[:, 0]
    if targeted:
        enroll = threshold + confidence - s
        imposter = s + confidence - threshold
    else:
        enroll = s + confidence - threshold
        imposter = threshold + confidence - s
    loss = jnp.where(label == 0, enroll, imposter)
    if clip_max:
        loss = jnp.maximum(0.0, loss)
    return loss


if __name__ == "__main__":
    key = jax.random.PRNGKey(0)
    k1, k2, k3 = jax.random.split(key, 3)

    B, num_class = 16, 12
    scores = jax.random.normal(k1, (B, num_class), dtype=jnp.float32)
    # Mix of valid labels and a couple of -1 ("imposter") labels.
    label = jax.random.randint(k2, (B,), 0, num_class, dtype=jnp.int32)
    label = label.at[3].set(-1).at[6].set(-1)

    # CSI (module defaults: targeted=False, confidence=0.0, clip_max=True).
    loss = sec4sr_margin_loss(scores, label, task='CSI')
    jax.block_until_ready(loss)
    ref = _reference_csi(scores, label)
    assert loss.shape == (B,) and loss.dtype == jnp.float32
    assert jnp.allclose(loss, ref, atol=1e-5, rtol=1e-5), (loss, ref)

    # CSI targeted.
    loss_t = sec4sr_margin_loss(scores, label, task='CSI', targeted=True,
                                confidence=0.05)
    jax.block_until_ready(loss_t)
    ref_t = _reference_csi(scores, label, targeted=True, confidence=0.05)
    assert jnp.allclose(loss_t, ref_t, atol=1e-5, rtol=1e-5)

    # bf16 scores stay bf16 in HBM and in the in-kernel selects/reductions.
    scores_bf16 = scores.astype(jnp.bfloat16)
    loss_bf16 = sec4sr_margin_loss(scores_bf16, label, task='CSI')
    jax.block_until_ready(loss_bf16)
    ref_bf16 = _reference_csi(scores_bf16, label)
    assert jnp.allclose(loss_bf16, ref_bf16, atol=1e-2, rtol=1e-2)

    # OSI (untargeted + targeted) with a threshold.
    for tgt in (False, True):
        loss_osi = sec4sr_margin_loss(scores, label, task='OSI', threshold=0.25,
                                      targeted=tgt, confidence=0.1)
        jax.block_until_ready(loss_osi)
        ref_osi = _reference_osi(scores, label, 0.25, targeted=tgt,
                                 confidence=0.1)
        assert jnp.allclose(loss_osi, ref_osi, atol=1e-5, rtol=1e-5)

    # SV: (B, 1) scores, labels in {0, -1}, lane-major kernel path.
    sv_scores = jax.random.normal(k3, (B, 1), dtype=jnp.float32)
    sv_label = jnp.where(jnp.arange(B) % 3 == 0, -1, 0).astype(jnp.int32)
    for tgt in (False, True):
        loss_sv = sec4sr_margin_loss(sv_scores, sv_label, task='SV',
                                     threshold=0.1, targeted=tgt,
                                     confidence=0.2)
        jax.block_until_ready(loss_sv)
        ref_sv = _reference_sv(sv_scores, sv_label, 0.1, targeted=tgt,
                               confidence=0.2)
        assert loss_sv.shape == (B,)
        assert jnp.allclose(loss_sv, ref_sv, atol=1e-5, rtol=1e-5)

    print("KERNEL_OK")
</pallas_src>

<mosaic_0001>
module attributes {stable_mosaic.version = 11 : i64} {
  func.func @_csi_osi_kernel(%arg0: i32, %arg1: memref<16x1xi32, #tpu.memory_space<vmem>>, %arg2: memref<16x12xf32, #tpu.memory_space<vmem>>, %arg3: memref<16x1xf32, #tpu.memory_space<vmem>>) attributes {dimension_semantics = [#tpu.dimension_semantics<parallel>], iteration_bounds = array<i64: 1>, scalar_prefetch = 0 : i64, scratch_operands = 0 : i64, tpu.core_type = #tpu.core_type<tc>, window_params = [{transform_indices = @transform_0, window_bounds = array<i64: 16, 1>}, {transform_indices = @transform_1, window_bounds = array<i64: 16, 12>}, {transform_indices = @transform_2, window_bounds = array<i64: 16, 1>}]} {
    %c0 = arith.constant 0 : index
    %c0_0 = arith.constant 0 : index
    %0 = vector.load %arg2[%c0, %c0_0] : memref<16x12xf32, #tpu.memory_space<vmem>>, vector<16x12xf32>
    %c0_1 = arith.constant 0 : index
    %c0_2 = arith.constant 0 : index
    %1 = vector.load %arg1[%c0_1, %c0_2] : memref<16x1xi32, #tpu.memory_space<vmem>>, vector<16x1xi32>
    %2 = tpu.iota {dimensions = array<i32: 1>} : vector<16x12xi32>
    %3 = vector.broadcast %1 : vector<16x1xi32> to vector<16x12xi32>
    %4 = arith.cmpi eq, %2, %3 : vector<16x12xi32>
    %cst = arith.constant 0.000000e+00 : f32
    %5 = vector.broadcast %cst : f32 to vector<16x12xf32>
    %6 = arith.select %4, %0, %5 : vector<16x12xi1>, vector<16x12xf32>
    %cst_3 = arith.constant dense<0.000000e+00> : vector<16xf32>
    %7 = vector.multi_reduction <add>, %6, %cst_3 [1] : vector<16x12xf32> to vector<16xf32>
    %8 = vector.shape_cast %7 : vector<16xf32> to vector<16x1xf32>
    %cst_4 = arith.constant 0xFF800000 : f32
    %9 = vector.broadcast %cst_4 : f32 to vector<16x12xf32>
    %10 = arith.select %4, %9, %0 : vector<16x12xi1>, vector<16x12xf32>
    %cst_5 = arith.constant dense<0xFF800000> : vector<16xf32>
    %11 = vector.multi_reduction <maximumf>, %10, %cst_5 [1] : vector<16x12xf32> to vector<16xf32>
    %12 = vector.shape_cast %11 : vector<16xf32> to vector<16x1xf32>
    %cst_6 = arith.constant 0.000000e+00 : f32
    %13 = vector.broadcast %cst_6 : f32 to vector<16x1xf32>
    %14 = arith.addf %8, %13 : vector<16x1xf32>
    %15 = arith.subf %14, %12 : vector<16x1xf32>
    %cst_7 = arith.constant 0.000000e+00 : f32
    %16 = vector.broadcast %cst_7 : f32 to vector<16x1xf32>
    %c-1_i32 = arith.constant -1 : i32
    %17 = vector.broadcast %c-1_i32 : i32 to vector<16x1xi32>
    %18 = arith.cmpi eq, %1, %17 : vector<16x1xi32>
    %19 = arith.select %18, %16, %15 : vector<16x1xi1>, vector<16x1xf32>
    %cst_8 = arith.constant 0.000000e+00 : f32
    %20 = vector.broadcast %cst_8 : f32 to vector<16x1xf32>
    %21 = arith.maximumf %20, %19 : vector<16x1xf32>
    %c0_9 = arith.constant 0 : index
    %c0_10 = arith.constant 0 : index
    %22 = vector.load %arg3[%c0_9, %c0_10] : memref<16x1xf32, #tpu.memory_space<vmem>>, vector<16x1xf32>
    tpu.vector_store %arg3[%c0_9, %c0_10], %21 {strides = array<i32>} : memref<16x1xf32, #tpu.memory_space<vmem>>, vector<16x1xf32>,
    return
  }
  func.func @transform_0(%arg0: i32) -> (i32, i32) {
    %c0_i32 = arith.constant 0 : i32
    %c0_i32_0 = arith.constant 0 : i32
    return %arg0, %c0_i32 : i32, i32
  }
  func.func @transform_1(%arg0: i32) -> (i32, i32) {
    %c0_i32 = arith.constant 0 : i32
    %c0_i32_0 = arith.constant 0 : i32
    return %arg0, %c0_i32 : i32, i32
  }
  func.func @transform_2(%arg0: i32) -> (i32, i32) {
    %c0_i32 = arith.constant 0 : i32
    %c0_i32_0 = arith.constant 0 : i32
    return %arg0, %c0_i32 : i32, i32
  }
}

</mosaic_0001>

<bundles_post_ra>
// kernel: tpu_custom_call.1
= control target key start
LH: loop header
LB: loop body
LE: loop exit
PB: predicated region body
PF: predicated region fallthrough
CT: control target
= control target key end

     0   :  { %v61_v0 = vmov 0   ;;  %v15_v3 = vlaneseq  ;;  %vm27_vm0 = vcmask 97280   ;;  %vm52_vm4 = vcmask 7168   ;;  %s95_s0 = inlined_call_operand.vmem [shape: s32[16,1], index: 0, kind: input, shape index: {}]   ;;  %s96_s1 = inlined_call_operand.vmem [shape: f32[16,12], index: 1, kind: input, shape index: {}]   ;;  %s97_s2 = inlined_call_operand.vmem [shape: f32[16,1], index: 2, kind: output, shape index: {}]  }
   0x1   :  { %60 = vset.pattern.permute.xlu0 %v61_v0  ;;  %v13_v1 = vld [vmem:[%s95_s0] sm:$0xff]  ;;  %v14_v2 = vld [vmem:[%s95_s0 + $0x8] sm:$0xff] }
   0x2   :  { %18 = vperm.xlu0 %60, %v13_v1   ;;  %v16_v4 = vand.u32 127, %v15_v3  ;;  %v11_v5 = vld [vmem:[%s96_s1] sm:$0xff]  ;;  %v12_v11 = vld [vmem:[%s96_s1 + $0x8] sm:$0xff]  ;;  %vm46_vm3 = vcmp.eq.s32.totalorder %v13_v1, 4294967295  ;;  %vm47_vm5 = vcmp.eq.s32.totalorder %v14_v2, 4294967295 }
   0x6   :  { %21 = vperm.xlu0 %60, %v14_v2  }
  0x81   :  { %v19_v6 = vpop.permute.xlu0 %18 }
  0x82   :  { %vm23_vm1 = vcmp.eq.s32.totalorder %v16_v4, %v19_v6 }
  0x83   :  { %v34_v7 = vsel %vm23_vm1, -inf, %v11_v5  ;;  %v25_v8 = vsel %vm23_vm1, %v11_v5, 0.0 }
  0x84   :  { %v36_v9 = vsel %vm27_vm0, %v34_v7, -inf  ;;  %v28_v10 = vsel %vm27_vm0, %v25_v8, 0.0 }
  0x85   :  { %37 = vmax.xlane.f32.xlu0 %v36_v9  ;;  %29 = vadd.xlane.f32.xlu1 %v28_v10  ;;  %v22_v12 = vpop.permute.xlu0 %21 }
  0x86   :  { %vm24_vm2 = vcmp.eq.s32.totalorder %v16_v4, %v22_v12 }
  0x87   :  { %v26_v13 = vsel %vm24_vm2, %v12_v11, 0.0  ;;  %v35_v15 = vsel %vm24_vm2, -inf, %v12_v11 }
  0x88   :  { %v31_v14 = vsel %vm27_vm0, %v26_v13, 0.0  ;;  %v39_v16 = vsel %vm27_vm0, %v35_v15, -inf }
  0x89   :  { %32 = vadd.xlane.f32.xlu1 %v31_v14 }
  0x8d   :  { %40 = vmax.xlane.f32.xlu1 %v39_v16 }
 0x112   :  { %v30_v17 = vpop.xlane.xlu1 %29  ;;  %v38_v18 = vpop.xlane.xlu0 %37 }
 0x113   :  { %v44_v19 = vsub.f32 %v30_v17, %v38_v18 }
 0x115   :  { %v48_v20 = vsel %vm46_vm3, 0.0, %v44_v19 }
 0x116   :  { %v50_v21 = vmax.f32 %v48_v20, 0.0  ;;  %v33_v22 = vpop.xlane.xlu1 %32 }
 0x118   :  { %53 = vst.msk [vmem:[%s97_s2] sm:$0xff] %vm52_vm4, %v50_v21 }
 0x11a   :  { %v41_v23 = vpop.xlane.xlu1 %40 }
 0x11b   :  { %v45_v24 = vsub.f32 %v33_v22, %v41_v23 }
 0x11d   :  { %v49_v25 = vsel %vm47_vm5, 0.0, %v45_v24 }
 0x11e   :  { %v51_v26 = vmax.f32 %v49_v25, 0.0 }
 0x120   :  { %54 = vst.msk [vmem:[%s97_s2 + $0x8] sm:$0xff] %vm52_vm4, %v51_v26 }

</bundles_post_ra>
